<compile_context>
chip_gen: v5e
topology: v5e:2x2
jax: 0.10.0
libtpu: 0.0.40
codegen_flags: <defaults>
</compile_context>

<pallas_src>
import functools

import jax
import jax.numpy as jnp
from jax.experimental import pallas as pl
from jax.experimental.pallas import tpu as pltpu

_MIB = 1024 * 1024


# ---------------------------------------------------------------------------
# VMEM / tile planning helpers (generation-aware, safe fallbacks).
# ---------------------------------------------------------------------------
def _vmem_capacity_bytes():
    try:
        info = pltpu.get_tpu_info()
        cap = int(getattr(info, "vmem_capacity_bytes", 0))
        if cap > 0:
            return cap
    except Exception:
        pass
    return 64 * _MIB  # conservative (v7x-sized) fallback


def _tile_target_bytes(cap):
    # ~cap/16 per x-tile: 8 MiB on 128 MiB parts (v5e/v6e), 4 MiB on v7x (64 MiB).
    return int(min(8 * _MIB, max(2 * _MIB, cap // 16)))


def _vmem_limit_bytes(tile_bytes, cap):
    # 2x double-buffered input + 2x output + f32 upcast/temporaries + headroom,
    # bounded to <= 3/4 of physical VMEM.
    want = 8 * int(tile_bytes) + 4 * _MIB
    return int(min(max(want, 32 * _MIB), (3 * cap) // 4))


def _round_up(v, m):
    return (v + m - 1) // m * m


def _ensure_two_steps(extent, tile):
    """Shrink a multiple-of-8 tile so the parallel axis has >=2 grid steps
    (otherwise one v7x TensorCore idles).  No-op when extent <= 8."""
    if extent > 8 and pl.cdiv(extent, tile) < 2:
        tile = max(8, _round_up(pl.cdiv(extent, 2), 8))
    return tile


# ---------------------------------------------------------------------------
# Kernels.
# ---------------------------------------------------------------------------
def _adain_norm_kernel(x_ref, s_ref, b_ref, o_ref, *, inv_hw, eps):
    """Fused instance-norm + affine over one (tr, HW) row tile.

    Single-traversal stats: var = E[x^2] - mean^2 (clamped >= 0).  The per-row
    scale is folded into inv_std so the epilogue is a single FMA per element.
    NOTE: a partial last row tile is padded by Pallas; padded rows may produce
    NaN/Inf in lanes that are discarded on writeback -- harmless by design.
    """
    x = x_ref[...].astype(jnp.float32)
    ssum = jnp.sum(x, axis=-1, keepdims=True)
    ssq = jnp.sum(x * x, axis=-1, keepdims=True)
    mean = ssum * inv_hw
    var = jnp.maximum(ssq * inv_hw - mean * mean, 0.0)
    a = s_ref[...] * jax.lax.rsqrt(var + eps)          # per-row scale * inv_std
    o_ref[...] = (a * x + (b_ref[...] - a * mean)).astype(o_ref.dtype)


def _adain_norm_colsplit_kernel(x_ref, s_ref, b_ref, o_ref, acc1, acc2, *, inv_hw, eps):
    """Two-phase (stats, apply) variant for large H*W, column-tiled.

    grid = (row_tiles, 2 phases, col_tiles).  Phase 0 accumulates per-row
    sum / sum-of-squares across col tiles; on its last col step it converts the
    accumulators into per-row (scale, shift).  Phase 1 re-reads x and writes
    the output (the output BlockSpec stays parked on block 0 during phase 0,
    so no garbage writebacks happen).
    """
    p = pl.program_id(1)
    j = pl.program_id(2)
    nj = pl.num_programs(2)

    @pl.when(jnp.logical_and(p == 0, j == 0))
    def _init():
        acc1[...] = jnp.zeros_like(acc1)
        acc2[...] = jnp.zeros_like(acc2)

    x = x_ref[...].astype(jnp.float32)

    @pl.when(p == 0)
    def _accumulate():
        acc1[...] += jnp.sum(x, axis=-1, keepdims=True)
        acc2[...] += jnp.sum(x * x, axis=-1, keepdims=True)

    @pl.when(jnp.logical_and(p == 0, j == nj - 1))
    def _finalize_stats():
        mean = acc1[...] * inv_hw
        var = jnp.maximum(acc2[...] * inv_hw - mean * mean, 0.0)
        a = s_ref[...] * jax.lax.rsqrt(var + eps)
        acc1[...] = a                          # reuse scratch: per-row scale
        acc2[...] = b_ref[...] - a * mean      # reuse scratch: per-row shift

    @pl.when(p == 1)
    def _apply():
        o_ref[...] = (acc1[...] * x + acc2[...]).astype(o_ref.dtype)


def _adain_masked_kernel(x_ref, m_ref, s0_ref, b0_ref, s1_ref, b1_ref, o_ref, *, inv_hw, eps):
    """Fused instance-norm + per-pixel masked blend of two affine sets.

    x_ref: (1, tc, HW)   m_ref: (1, 1, HW)   params: (1, tc, 1).
      out = m*((1+g0)*xn + b0) + (1-m)*((1+g1)*xn + b1)
          = (a1 + m*(a0-a1))*x + (c1 + m*(c0-c1))
      with a_k = s_k*inv_std and c_k = b_k - a_k*mean (per-row constants).
    Single HBM read of x + mask, single write of out.
    """
    x = x_ref[...].astype(jnp.float32)
    m = m_ref[...].astype(jnp.float32)
    ssum = jnp.sum(x, axis=-1, keepdims=True)
    ssq = jnp.sum(x * x, axis=-1, keepdims=True)
    mean = ssum * inv_hw
    var = jnp.maximum(ssq * inv_hw - mean * mean, 0.0)
    inv_std = jax.lax.rsqrt(var + eps)
    a0 = s0_ref[...] * inv_std
    a1 = s1_ref[...] * inv_std
    c0 = b0_ref[...] - a0 * mean
    c1 = b1_ref[...] - a1 * mean
    a = a1 + m * (a0 - a1)
    c = c1 + m * (c0 - c1)
    o_ref[...] = (a * x + c).astype(o_ref.dtype)


# ---------------------------------------------------------------------------
# Wrappers.
# ---------------------------------------------------------------------------
def adain_norm_pallas(x, scale_rows, shift_rows, *, eps=1e-5,
                      force_col_split=False, max_col_tile=None):
    """x: (N, C, H, W).  scale_rows/shift_rows: (N*C,) per-(n,c) affine params.

    Returns scale * instance_norm(x) + shift, same shape/dtype as x.
    """
    n, c, h, w = x.shape
    rows, cols = n * c, h * w
    itemsize = x.dtype.itemsize

    x2d = x.reshape(rows, cols)
    s_col = scale_rows.reshape(rows, 1).astype(jnp.float32)
    b_col = shift_rows.reshape(rows, 1).astype(jnp.float32)

    cap = _vmem_capacity_bytes()
    target_bytes = _tile_target_bytes(cap)
    row_bytes = cols * itemsize

    use_col_split = force_col_split or (8 * row_bytes > target_bytes and cols % 128 == 0)
    # TODO(synk): huge H*W that is NOT a multiple of 128 stays on the full-row
    # path with a raised VMEM budget (no padded-lane masking implemented).

    if not use_col_split:
        # ---- simple path: full spatial extent per block, row-tiled grid -----
        if rows <= 8:
            tr = rows                                    # full extent -> always legal
        else:
            tr = min(rows, max(8, (target_bytes // max(1, row_bytes)) // 8 * 8))
            tr = _ensure_two_steps(rows, tr)             # keep both v7x TCs busy
        grid = (pl.cdiv(rows, tr),)
        tile_bytes = tr * cols * itemsize

        kernel = functools.partial(_adain_norm_kernel,
                                   inv_hw=float(1.0 / cols), eps=float(eps))
        cost = pl.CostEstimate(
            flops=9 * rows * cols, transcendentals=rows,
            bytes_accessed=2 * rows * cols * itemsize + 2 * rows * 4)

        out2d = pl.pallas_call(
            kernel,
            out_shape=jax.ShapeDtypeStruct((rows, cols), x.dtype),
            grid_spec=pltpu.PrefetchScalarGridSpec(
                num_scalar_prefetch=0,
                grid=grid,
                in_specs=[
                    pl.BlockSpec((tr, cols), lambda i: (i, 0)),
                    pl.BlockSpec((tr, 1), lambda i: (i, 0)),
                    pl.BlockSpec((tr, 1), lambda i: (i, 0)),
                ],
                out_specs=pl.BlockSpec((tr, cols), lambda i: (i, 0)),
            ),
            compiler_params=pltpu.CompilerParams(
                dimension_semantics=("parallel",),
                vmem_limit_bytes=_vmem_limit_bytes(tile_bytes, cap),
            ),
            cost_estimate=cost,
        )(x2d, s_col, b_col)
        return out2d.reshape(n, c, h, w)

    # ---- column-split path: two-phase (stats, apply) over column tiles ------
    assert cols % 128 == 0, "column-split path requires H*W to be a multiple of 128"
    cap_tc = max(128, (target_bytes // (8 * itemsize)) // 128 * 128)
    if max_col_tile is not None:
        cap_tc = min(cap_tc, max(128, int(max_col_tile) // 128 * 128))
    tc = 128
    for cand in range(128, min(cols, cap_tc) + 1, 128):   # largest mult-of-128 divisor
        if cols % cand == 0:
            tc = cand
    nj = cols // tc

    if rows <= 8:
        tr = rows
    else:
        tr = min(rows, max(8, (target_bytes // max(1, tc * itemsize)) // 8 * 8))
        tr = _ensure_two_steps(rows, tr)
    grid = (pl.cdiv(rows, tr), 2, nj)
    tile_bytes = tr * tc * itemsize

    kernel = functools.partial(_adain_norm_colsplit_kernel,
                               inv_hw=float(1.0 / cols), eps=float(eps))
    cost = pl.CostEstimate(
        flops=9 * rows * cols, transcendentals=rows,
        bytes_accessed=3 * rows * cols * itemsize + 2 * rows * 4)

    out2d = pl.pallas_call(
        kernel,
        out_shape=jax.ShapeDtypeStruct((rows, cols), x.dtype),
        grid_spec=pltpu.PrefetchScalarGridSpec(
            num_scalar_prefetch=0,
            grid=grid,
            in_specs=[
                pl.BlockSpec((tr, tc), lambda i, p, j: (i, j)),
                pl.BlockSpec((tr, 1), lambda i, p, j: (i, 0)),
                pl.BlockSpec((tr, 1), lambda i, p, j: (i, 0)),
            ],
            # Park the output on block (i, 0) during phase 0 (never written),
            # write blocks (i, j) during phase 1.
            out_specs=pl.BlockSpec((tr, tc), lambda i, p, j: (i, p * j)),
            scratch_shapes=[pltpu.VMEM((tr, 1), jnp.float32),
                            pltpu.VMEM((tr, 1), jnp.float32)],
        ),
        compiler_params=pltpu.CompilerParams(
            dimension_semantics=("parallel", "arbitrary", "arbitrary"),
            vmem_limit_bytes=_vmem_limit_bytes(tile_bytes, cap),
        ),
        cost_estimate=cost,
    )(x2d, s_col, b_col)
    return out2d.reshape(n, c, h, w)


def adain_masked_pallas(x, mask, scale0, shift0, scale1, shift1, *, eps=1e-5):
    """Fused masked AdaIN.  x: (N,C,H,W), mask: (N,1,H,W) (already resized),
    scale*/shift*: (N,C).  Returns mask*(s0*xn + b0) + (1-mask)*(s1*xn + b1)."""
    n, c, h, w = x.shape
    hw = h * w
    itemsize = x.dtype.itemsize
    cap = _vmem_capacity_bytes()
    target_bytes = _tile_target_bytes(cap)

    fusable = (tuple(mask.shape) == (n, 1, h, w)) and (min(8, c) * hw * itemsize <= 2 * target_bytes)
    if not fusable:
        # TODO(synk): no column-tiled masked kernel; fall back to normalize-then-blend
        # (extra HBM passes) for very large H*W or non-(N,1,H,W) masks.
        xn = adain_norm_pallas(x, jnp.ones((n * c,), jnp.float32),
                               jnp.zeros((n * c,), jnp.float32), eps=eps)
        out0 = scale0[:, :, None, None] * xn + shift0[:, :, None, None]
        out1 = scale1[:, :, None, None] * xn + shift1[:, :, None, None]
        return (mask * out0 + (1.0 - mask) * out1).astype(x.dtype)

    x3 = x.reshape(n, c, hw)
    m3 = mask.reshape(n, 1, hw).astype(jnp.float32)
    s0 = scale0.reshape(n, c, 1).astype(jnp.float32)
    b0 = shift0.reshape(n, c, 1).astype(jnp.float32)
    s1 = scale1.reshape(n, c, 1).astype(jnp.float32)
    b1 = shift1.reshape(n, c, 1).astype(jnp.float32)

    # Channel tile: multiple of 8 (or full C), sized so (tc, HW) ~ target bytes.
    if c <= 8:
        tc = c
    else:
        tc = int(max(8, min((c // 8) * 8, (target_bytes // max(1, hw * itemsize)) // 8 * 8)))
        if n * pl.cdiv(c, tc) < 2:
            tc = _ensure_two_steps(c, tc)

    grid = (n, pl.cdiv(c, tc))
    tile_bytes = tc * hw * itemsize

    kernel = functools.partial(_adain_masked_kernel,
                               inv_hw=float(1.0 / hw), eps=float(eps))
    cost = pl.CostEstimate(
        flops=13 * n * c * hw, transcendentals=n * c,
        bytes_accessed=(2 * n * c * hw + n * hw) * itemsize + 4 * n * c * 4)

    out3 = pl.pallas_call(
        kernel,
        out_shape=jax.ShapeDtypeStruct((n, c, hw), x.dtype),
        grid_spec=pltpu.PrefetchScalarGridSpec(
            num_scalar_prefetch=0,
            grid=grid,
            in_specs=[
                pl.BlockSpec((1, tc, hw), lambda b, ci: (b, ci, 0)),
                pl.BlockSpec((1, 1, hw), lambda b, ci: (b, 0, 0)),
                pl.BlockSpec((1, tc, 1), lambda b, ci: (b, ci, 0)),
                pl.BlockSpec((1, tc, 1), lambda b, ci: (b, ci, 0)),
                pl.BlockSpec((1, tc, 1), lambda b, ci: (b, ci, 0)),
                pl.BlockSpec((1, tc, 1), lambda b, ci: (b, ci, 0)),
            ],
            out_specs=pl.BlockSpec((1, tc, hw), lambda b, ci: (b, ci, 0)),
        ),
        compiler_params=pltpu.CompilerParams(
            dimension_semantics=("parallel", "parallel"),
            vmem_limit_bytes=_vmem_limit_bytes(tile_bytes, cap),
        ),
        cost_estimate=cost,
    )(x3, m3, s0, b0, s1, b1)
    return out3.reshape(n, c, h, w)


# ---------------------------------------------------------------------------
# Module.
# ---------------------------------------------------------------------------
class AdaIN2d:
    """JAX/Pallas equivalent of the PyTorch AdaIN2d module (forward only)."""

    def __init__(self, in_features, style_dim, key=None, dtype=jnp.float32):
        if key is None:
            key = jax.random.PRNGKey(0)
        k1, k2 = jax.random.split(key)
        # nn.Linear default init: U(-1/sqrt(fan_in), 1/sqrt(fan_in))
        bound = 1.0 / (style_dim ** 0.5)
        self.fc_weight = jax.random.uniform(k1, (in_features * 2, style_dim), dtype, -bound, bound)
        self.fc_bias = jax.random.uniform(k2, (in_features * 2,), dtype, -bound, bound)
        self.in_features = in_features
        self.eps = 1e-5  # nn.InstanceNorm2d default (affine=False, no running stats)

    def _fc(self, style_code):
        # Tiny (B, style_dim) x (style_dim, 2C) linear: plain JAX/XLA (not worth a kernel).
        return style_code @ self.fc_weight.T + self.fc_bias

    def __call__(self, x, style_code, mask=None):
        n, c, h, w = x.shape
        hvec = self._fc(style_code).astype(jnp.float32)

        if mask is None:
            gamma, beta = hvec[:, :c], hvec[:, c:]
            scale = (1.0 + gamma).reshape(n * c)
            shift = beta.reshape(n * c)
            return adain_norm_pallas(x, scale, shift, eps=self.eps)

        # Masked path: style_code holds two stacked style sets.
        assert 2 * n == style_code.shape[0]
        if mask.shape[2] != h or mask.shape[3] != w:
            # nearest-neighbour resize (matches F.interpolate(mode='nearest')).
            mask = jax.image.resize(mask, (mask.shape[0], mask.shape[1], h, w), method="nearest")
        h0, h1 = hvec[:n], hvec[n:]
        s0, b0 = 1.0 + h0[:, :c], h0[:, c:]
        s1, b1 = 1.0 + h1[:, :c], h1[:, c:]
        return adain_masked_pallas(x, mask, s0, b0, s1, b1, eps=self.eps)


# ---------------------------------------------------------------------------
# References & test.
# ---------------------------------------------------------------------------
def _reference_instance_norm(x, eps):
    mean = x.mean(axis=(2, 3), keepdims=True)
    var = x.var(axis=(2, 3), keepdims=True)            # biased, like InstanceNorm2d
    return (x - mean) / jnp.sqrt(var + eps)


def _reference_adain(x, style_code, W, b, eps=1e-5):
    c = x.shape[1]
    hvec = style_code @ W.T + b
    gamma, beta = hvec[:, :c], hvec[:, c:]
    xn = _reference_instance_norm(x, eps)
    return (1.0 + gamma)[:, :, None, None] * xn + beta[:, :, None, None]


def _reference_adain_masked(x, style_codes, mask, W, b, eps=1e-5):
    n, c, h, w = x.shape
    hvec = style_codes @ W.T + b
    if mask.shape[2] != h or mask.shape[3] != w:
        mask = jax.image.resize(mask, (mask.shape[0], mask.shape[1], h, w), method="nearest")
    h0, h1 = hvec[:n], hvec[n:]
    xn = _reference_instance_norm(x, eps)
    out0 = (1.0 + h0[:, :c])[:, :, None, None] * xn + h0[:, c:][:, :, None, None]
    out1 = (1.0 + h1[:, :c])[:, :, None, None] * xn + h1[:, c:][:, :, None, None]
    return mask * out0 + (1.0 - mask) * out1


if __name__ == "__main__":
    key = jax.random.PRNGKey(0)
    n, c, hh, ww, style_dim = 2, 4, 16, 16, 8
    kx, ks, ks2, km, kp = jax.random.split(key, 5)

    x = jax.random.normal(kx, (n, c, hh, ww), dtype=jnp.float32)
    style = jax.random.normal(ks, (n, style_dim), dtype=jnp.float32)

    mod = AdaIN2d(c, style_dim, key=kp)

    # --- unmasked path (fused instance-norm + affine kernel) ---
    out = jax.block_until_ready(mod(x, style))
    ref = _reference_adain(x, style, mod.fc_weight, mod.fc_bias, mod.eps)
    assert out.shape == (n, c, hh, ww)
    assert jnp.allclose(out, ref, atol=1e-4, rtol=1e-4), float(jnp.max(jnp.abs(out - ref)))

    # --- masked path (fused norm + per-pixel blend kernel, mask resized 2x) ---
    style2 = jax.random.normal(ks2, (2 * n, style_dim), dtype=jnp.float32)
    mask = (jax.random.uniform(km, (n, 1, hh // 2, ww // 2)) > 0.5).astype(jnp.float32)
    out_m = jax.block_until_ready(mod(x, style2, mask))
    ref_m = _reference_adain_masked(x, style2, mask, mod.fc_weight, mod.fc_bias, mod.eps)
    assert jnp.allclose(out_m, ref_m, atol=1e-4, rtol=1e-4), float(jnp.max(jnp.abs(out_m - ref_m)))

    # --- column-split (large H*W) code path, forced on small shapes to verify ---
    scale = jnp.full((n * c,), 1.25, jnp.float32)
    shift = jnp.full((n * c,), -0.5, jnp.float32)
    out_cs = jax.block_until_ready(
        adain_norm_pallas(x, scale, shift, eps=mod.eps,
                          force_col_split=True, max_col_tile=128))
    ref_cs = 1.25 * _reference_instance_norm(x, mod.eps) - 0.5
    assert jnp.allclose(out_cs, ref_cs, atol=1e-4, rtol=1e-4), float(jnp.max(jnp.abs(out_cs - ref_cs)))

    print("KERNEL_OK")
</pallas_src>

<mosaic_0001>
module attributes {stable_mosaic.version = 11 : i64} {
  func.func @_adain_norm_kernel(%arg0: i32, %arg1: memref<8x256xf32, #tpu.memory_space<vmem>>, %arg2: memref<8x1xf32, #tpu.memory_space<vmem>>, %arg3: memref<8x1xf32, #tpu.memory_space<vmem>>, %arg4: memref<8x256xf32, #tpu.memory_space<vmem>>) attributes {dimension_semantics = [#tpu.dimension_semantics<parallel>], iteration_bounds = array<i64: 1>, scalar_prefetch = 0 : i64, scratch_operands = 0 : i64, tpu.core_type = #tpu.core_type<tc>, window_params = [{transform_indices = @transform_0, window_bounds = array<i64: 8, 256>}, {transform_indices = @transform_1, window_bounds = array<i64: 8, 1>}, {transform_indices = @transform_2, window_bounds = array<i64: 8, 1>}, {transform_indices = @transform_3, window_bounds = array<i64: 8, 256>}]} {
    %c0 = arith.constant 0 : index
    %c0_0 = arith.constant 0 : index
    %0 = vector.load %arg1[%c0, %c0_0] : memref<8x256xf32, #tpu.memory_space<vmem>>, vector<8x256xf32>
    %cst = arith.constant dense<0.000000e+00> : vector<8xf32>
    %1 = vector.multi_reduction <add>, %0, %cst [1] : vector<8x256xf32> to vector<8xf32>
    %2 = vector.shape_cast %1 : vector<8xf32> to vector<8x1xf32>
    %3 = arith.mulf %0, %0 : vector<8x256xf32>
    %cst_1 = arith.constant dense<0.000000e+00> : vector<8xf32>
    %4 = vector.multi_reduction <add>, %3, %cst_1 [1] : vector<8x256xf32> to vector<8xf32>
    %5 = vector.shape_cast %4 : vector<8xf32> to vector<8x1xf32>
    %cst_2 = arith.constant 3.906250e-03 : f32
    %6 = vector.broadcast %cst_2 : f32 to vector<8x1xf32>
    %7 = arith.mulf %2, %6 : vector<8x1xf32>
    %cst_3 = arith.constant 3.906250e-03 : f32
    %8 = vector.broadcast %cst_3 : f32 to vector<8x1xf32>
    %9 = arith.mulf %5, %8 : vector<8x1xf32>
    %10 = arith.mulf %7, %7 : vector<8x1xf32>
    %11 = arith.subf %9, %10 : vector<8x1xf32>
    %cst_4 = arith.constant 0.000000e+00 : f32
    %12 = vector.broadcast %cst_4 : f32 to vector<8x1xf32>
    %13 = arith.maximumf %11, %12 : vector<8x1xf32>
    %c0_5 = arith.constant 0 : index
    %c0_6 = arith.constant 0 : index
    %14 = vector.load %arg2[%c0_5, %c0_6] : memref<8x1xf32, #tpu.memory_space<vmem>>, vector<8x1xf32>
    %cst_7 = arith.constant 9.99999974E-6 : f32
    %15 = vector.broadcast %cst_7 : f32 to vector<8x1xf32>
    %16 = arith.addf %13, %15 : vector<8x1xf32>
    %17 = math.rsqrt %16 : vector<8x1xf32>
    %18 = arith.mulf %14, %17 : vector<8x1xf32>
    %19 = vector.broadcast %18 : vector<8x1xf32> to vector<8x256xf32>
    %20 = arith.mulf %19, %0 : vector<8x256xf32>
    %c0_8 = arith.constant 0 : index
    %c0_9 = arith.constant 0 : index
    %21 = vector.load %arg3[%c0_8, %c0_9] : memref<8x1xf32, #tpu.memory_space<vmem>>, vector<8x1xf32>
    %22 = arith.mulf %18, %7 : vector<8x1xf32>
    %23 = arith.subf %21, %22 : vector<8x1xf32>
    %24 = vector.broadcast %23 : vector<8x1xf32> to vector<8x256xf32>
    %25 = arith.addf %20, %24 : vector<8x256xf32>
    %c0_10 = arith.constant 0 : index
    %c0_11 = arith.constant 0 : index
    %26 = vector.load %arg4[%c0_10, %c0_11] : memref<8x256xf32, #tpu.memory_space<vmem>>, vector<8x256xf32>
    tpu.vector_store %arg4[%c0_10, %c0_11], %25 {strides = array<i32>} : memref<8x256xf32, #tpu.memory_space<vmem>>, vector<8x256xf32>,
    return
  }
  func.func @transform_0(%arg0: i32) -> (i32, i32) {
    %c0_i32 = arith.constant 0 : i32
    %c0_i32_0 = arith.constant 0 : i32
    return %arg0, %c0_i32 : i32, i32
  }
  func.func @transform_1(%arg0: i32) -> (i32, i32) {
    %c0_i32 = arith.constant 0 : i32
    %c0_i32_0 = arith.constant 0 : i32
    return %arg0, %c0_i32 : i32, i32
  }
  func.func @transform_2(%arg0: i32) -> (i32, i32) {
    %c0_i32 = arith.constant 0 : i32
    %c0_i32_0 = arith.constant 0 : i32
    return %arg0, %c0_i32 : i32, i32
  }
  func.func @transform_3(%arg0: i32) -> (i32, i32) {
    %c0_i32 = arith.constant 0 : i32
    %c0_i32_0 = arith.constant 0 : i32
    return %arg0, %c0_i32 : i32, i32
  }
}

</mosaic_0001>

<bundles_post_ra>
// kernel: tpu_custom_call.1
= control target key start
LH: loop header
LB: loop body
LE: loop exit
PB: predicated region body
PF: predicated region fallthrough
CT: control target
= control target key end

     0   :  { %s147_s0 = inlined_call_operand.vmem [shape: f32[8,256], index: 0, kind: input, shape index: {}]   ;;  %s148_s1 = inlined_call_operand.vmem [shape: f32[8,1], index: 1, kind: input, shape index: {}]   ;;  %s149_s2 = inlined_call_operand.vmem [shape: f32[8,1], index: 2, kind: input, shape index: {}]   ;;  %s150_s3 = inlined_call_operand.hbm [shape: f32[8,256], index: 3, kind: output, shape index: {}]  }
   0x1   :  { %v15_v0 = vld [vmem:[%s147_s0] sm:$0xff]  ;;  %v16_v1 = vld [vmem:[%s147_s0 + $0x8] sm:$0xff] }
   0x2   :  { %8 = vsyncpa [#allocation3], 0  ;;  %v17_v2 = vadd.f32 %v16_v1, %v15_v0  ;;  %v20_v3 = vmul.f32 %v15_v0, %v15_v0  ;;  %v21_v4 = vmul.f32 %v16_v1, %v16_v1  ;;  %v110_v6 = vmov 0   ;;  %v30_v20 = vld [vmem:[%s148_s1] sm:$0xff]  ;;  %s111_s19 = smov [#allocation2]   ;;  %s69_s22 = sshll.u32 %s150_s3, 4  ;;  %s70_s22 = int_to_ptr.hbm [resolvable:$true] %s69_s22 }
   0x3   :  { %80 = vset.pattern.permute.xlu1 %v110_v6  ;;  %81 = vset.pattern.permute.xlu0 %v110_v6  ;;  %v50_v25 = vld [vmem:[%s149_s2] sm:$0xff]  ;;  %s67_s20 = sshll.u32 %s111_s19, 4  ;;  %s68_s20 = int_to_ptr.vmem [resolvable:$true] %s67_s20 }
   0x4   :  { %18 = vadd.xlane.f32.xlu0 %v17_v2  ;;  %v22_v5 = vadd.f32 %v21_v4, %v20_v3 }
   0xc   :  { %23 = vadd.xlane.f32.xlu0 %v22_v5 }
  0x77   :  { %v19_v7 = vpop.xlane.xlu0 %18 }
  0x78   :  { %v25_v8 = vmul.f32 0.00390625, %v19_v7 }
  0x7a   :  { %v27_v10 = vmul.f32 %v25_v8, %v25_v8 }
  0x7f   :  { %v24_v9 = vpop.xlane.xlu0 %23 }
  0x80   :  { %v26_v11 = vmul.f32 0.00390625, %v24_v9 }
  0x82   :  { %v28_v12 = vsub.f32 %v26_v11, %v27_v10 }
  0x84   :  { %v29_v13 = vmax.f32 %v28_v12, 0.0 }
  0x86   :  { %v31_v14 = vadd.f32 1e-05, %v29_v13 }
  0x88   :  { %82 = vrsqrt.f32 %v31_v14  ;;  %vm38_vm1 = vweird.f32 %v31_v14 }
  0x8e   :  { %v83_v15 = vpop.eup %82 }
  0x8f   :  { %v33_v16 = vmul.f32 %v83_v15, %v31_v14  ;;  %vm39_vm0 = vweird.f32 %v83_v15 }
  0x90   :  { %vm40_vm2 = vmor %vm38_vm1, %vm39_vm0 }
  0x91   :  { %v34_v17 = vmul.f32 %v83_v15, %v33_v16 }
  0x93   :  { %v35_v18 = vmul.f32 0.5, %v34_v17 }
  0x95   :  { %v36_v19 = vsub.f32 1.5, %v35_v18 }
  0x97   :  { %v37_v21 = vmul.f32 %v83_v15, %v36_v19 }
  0x99   :  { %v41_v22 = vsel %vm40_vm2, %v83_v15, %v37_v21 }
  0x9a   :  { %v42_v23 = vmul.f32 %v41_v22, %v30_v20 }
  0x9c   :  { %45 = vperm.xlu1 %80, %v42_v23   ;;  %v51_v24 = vmul.f32 %v42_v23, %v25_v8 }
  0x9e   :  { %v52_v26 = vsub.f32 %v50_v25, %v51_v24 }
  0xa4   :  { %55 = vperm.xlu1 %80, %v52_v26  }
 0x10e   :  { %v46_v27 = vpop.permute.xlu1 %45 }
 0x10f   :  { %v48_v28 = vmul.f32 %v46_v27, %v15_v0  ;;  %v49_v29 = vmul.f32 %v46_v27, %v16_v1 }
 0x116   :  { %v56_v30 = vpop.permute.xlu1 %55 }
 0x117   :  { %v58_v31 = vadd.f32 %v56_v30, %v48_v28  ;;  %v59_v32 = vadd.f32 %v56_v30, %v49_v29 }
 0x119   :  { %60 = vst [vmem:[#allocation2] sm:$0xff] %v58_v31 }
 0x11a   :  { %61 = vst [vmem:[#allocation2 + $0x8] sm:$0xff] %v59_v32 }
 0x11b   :  { %72 = dma.vmem_to_hbm [thread:$0]  %s68_s20, 256, %s70_s22, [#allocation3]  }
 0x11c   :  { %108 = dma.done.wait [#allocation3], 256  }
 0x11d   :  { %109 = vsyncadd [#allocation3], 4294967040 }
 0x11e   :  { %77 = vsyncpa [#allocation3], 1 }

</bundles_post_ra>
